<compile_context>
chip_gen: v7x
topology: tpu7x:2x2x1
jax: 0.10.0
libtpu: 0.0.40
codegen_flags: <defaults>
</compile_context>

<pallas_src>
import jax
import jax.numpy as jnp
from jax.experimental import pallas as pl
from jax.experimental.pallas import tpu as pltpu


def _log2_kernel(x_ref, o_ref):
    # Pure streaming kernel: EUP handles the transcendental, DMA is the
    # bottleneck.
    o_ref[...] = jnp.log2(x_ref[...])


def _round_up(v: int, m: int) -> int:
    return ((v + m - 1) // m) * m


def _device_kind() -> str:
    try:
        return jax.devices()[0].device_kind.lower()
    except Exception:
        return ""


def log2_pallas(x: jax.Array) -> jax.Array:
    assert x.ndim == 2, "module is annotated for rank-2 input"
    orig_shape = x.shape
    M, N = x.shape
    itemsize = jnp.dtype(x.dtype).itemsize

    # --- lane-unfriendly narrow inputs: reshape to a lane-dense slab --------
    # (masked <128-lane stores / <512 B DMA rows are the worst case; a
    #  contiguous reshape is metadata-only and log2 is elementwise.)
    if N < 128:
        total = M * N
        for lanes in (1024, 512, 256, 128):
            if total % lanes == 0:
                x = x.reshape(total // lanes, lanes)
                M, N = x.shape
                break

    total_bytes = M * N * itemsize

    # --- generation-aware parameters ----------------------------------------
    kind = _device_kind()
    is_v7 = "v7" in kind
    is_v5e = ("v5e" in kind) or ("v5 lite" in kind) or ("v5litepod" in kind)
    scoped_vmem_default = (16 << 20) if is_v5e else (32 << 20)
    max_tile_bytes = (6 << 20) if is_v7 else (4 << 20)

    # --- tile selection ------------------------------------------------------
    row_bytes = N * itemsize
    if row_bytes * 8 <= max_tile_bytes:
        # Full-row tiles: contiguous HBM blocks, unmasked lane-dense stores.
        tn = N
        tm_budget = max(8, (max_tile_bytes // row_bytes) // 8 * 8)
        tm = M if M <= tm_budget else tm_budget

        # v7x: shard the 1-D grid across both TensorCores with balanced,
        # preferably even, step counts (small inputs stay a single block,
        # fixed overhead dominates there).
        if is_v7 and total_bytes >= (256 << 10) and M > 8:
            steps = pl.cdiv(M, tm)
            if steps == 1:
                tm = min(tm, max(8, _round_up(pl.cdiv(M, 2), 8)))
                steps = pl.cdiv(M, tm)
            tries = 0
            while steps % 2 == 1 and steps > 1 and tm > 8 and tries < 8:
                tm -= 8
                steps = pl.cdiv(M, tm)
                tries += 1

        grid = (pl.cdiv(M, tm),)
        in_specs = [pl.BlockSpec((tm, tn), lambda i: (i, 0))]
        out_specs = pl.BlockSpec((tm, tn), lambda i: (i, 0))
        dim_sem = ("parallel",)
    else:
        # Extremely wide rows: also tile the lane dimension (multiple of 128).
        tn = min(N, max(128, (max_tile_bytes // (8 * itemsize)) // 128 * 128))
        tm = M if M <= 8 else 8
        grid = (pl.cdiv(M, tm), pl.cdiv(N, tn))
        in_specs = [pl.BlockSpec((tm, tn), lambda i, j: (i, j))]
        out_specs = pl.BlockSpec((tm, tn), lambda i, j: (i, j))
        dim_sem = ("parallel", "parallel")

    # --- scoped VMEM limit, only when the footprint needs it ----------------
    footprint = 4 * tm * tn * itemsize  # double-buffered input + output
    headroom = 4 << 20
    compiler_kwargs = dict(dimension_semantics=dim_sem)
    if footprint + headroom > scoped_vmem_default:
        compiler_kwargs["vmem_limit_bytes"] = int(footprint + headroom)

    # TODO(synk): add input_output_aliases={0: 0} if callers donate x (saves a
    # second HBM allocation for very large tensors).
    out = pl.pallas_call(
        _log2_kernel,
        out_shape=jax.ShapeDtypeStruct((M, N), x.dtype),
        grid_spec=pl.GridSpec(
            grid=grid,
            in_specs=in_specs,
            out_specs=out_specs,
        ),
        compiler_params=pltpu.CompilerParams(**compiler_kwargs),
        cost_estimate=pl.CostEstimate(
            flops=0, transcendentals=M * N, bytes_accessed=2 * total_bytes
        ),
    )(x)

    return out.reshape(orig_shape)


if __name__ == "__main__":
    key = jax.random.PRNGKey(0)
    k1, k2, k3 = jax.random.split(key, 3)

    # Small lane-dense shape (single full block path).
    x_small = jax.random.uniform(
        k1, (16, 256), dtype=jnp.float32, minval=0.1, maxval=10.0
    )
    y_small = log2_pallas(x_small)
    jax.block_until_ready(y_small)
    assert y_small.shape == x_small.shape
    assert jnp.allclose(y_small, jnp.log2(x_small), rtol=1e-6, atol=1e-6), (
        "mismatch vs jnp.log2 (small lane-dense path)"
    )

    # Narrow last dim (< 128): exercises the lane-dense reshape path.
    x_narrow = jax.random.uniform(
        k2, (32, 40), dtype=jnp.float32, minval=0.1, maxval=10.0
    )
    y_narrow = log2_pallas(x_narrow)
    jax.block_until_ready(y_narrow)
    assert y_narrow.shape == x_narrow.shape
    assert jnp.allclose(y_narrow, jnp.log2(x_narrow), rtol=1e-6, atol=1e-6), (
        "mismatch vs jnp.log2 (narrow reshape path)"
    )

    # Non-aligned dims: exercises full-row tiling / row-block remainders.
    x_big = jax.random.uniform(
        k3, (520, 1200), dtype=jnp.float32, minval=0.1, maxval=10.0
    )
    y_big = log2_pallas(x_big)
    jax.block_until_ready(y_big)
    assert y_big.shape == x_big.shape
    assert jnp.allclose(y_big, jnp.log2(x_big), rtol=1e-6, atol=1e-6), (
        "mismatch vs jnp.log2 (full-row tiled path)"
    )

    print("KERNEL_OK")
</pallas_src>

<mosaic_0001>
module attributes {stable_mosaic.version = 11 : i64} {
  func.func @_log2_kernel(%arg0: i32, %arg1: memref<16x256xf32, #tpu.memory_space<vmem>>, %arg2: memref<16x256xf32, #tpu.memory_space<vmem>>) attributes {dimension_semantics = [#tpu.dimension_semantics<parallel>], iteration_bounds = array<i64: 1>, scalar_prefetch = 0 : i64, scratch_operands = 0 : i64, tpu.core_type = #tpu.core_type<tc>, window_params = [{transform_indices = @transform_0, window_bounds = array<i64: 16, 256>}, {transform_indices = @transform_1, window_bounds = array<i64: 16, 256>}]} {
    %c0 = arith.constant 0 : index
    %c0_0 = arith.constant 0 : index
    %0 = vector.load %arg1[%c0, %c0_0] : memref<16x256xf32, #tpu.memory_space<vmem>>, vector<16x256xf32>
    %1 = math.log %0 : vector<16x256xf32>
    %cst = arith.constant 2.000000e+00 : f32
    %2 = math.log %cst : f32
    %3 = vector.broadcast %2 : f32 to vector<16x256xf32>
    %4 = arith.divf %1, %3 : vector<16x256xf32>
    %c0_1 = arith.constant 0 : index
    %c0_2 = arith.constant 0 : index
    %5 = vector.load %arg2[%c0_1, %c0_2] : memref<16x256xf32, #tpu.memory_space<vmem>>, vector<16x256xf32>
    tpu.vector_store %arg2[%c0_1, %c0_2], %4 {strides = array<i32>} : memref<16x256xf32, #tpu.memory_space<vmem>>, vector<16x256xf32>,
    return
  }
  func.func @transform_0(%arg0: i32) -> (i32, i32) {
    %c0_i32 = arith.constant 0 : i32
    %c0_i32_0 = arith.constant 0 : i32
    return %arg0, %c0_i32 : i32, i32
  }
  func.func @transform_1(%arg0: i32) -> (i32, i32) {
    %c0_i32 = arith.constant 0 : i32
    %c0_i32_0 = arith.constant 0 : i32
    return %arg0, %c0_i32 : i32, i32
  }
}

</mosaic_0001>

<bundles_post_ra>
// kernel: tpu_custom_call.1
= control target key start
LH: loop header
LB: loop body
LE: loop exit
PB: predicated region body
PF: predicated region fallthrough
CT: control target
= control target key end

     0   :  { %6 = vsyncpa [#allocation3], 0  ;;  %s165_s0 = inlined_call_operand.hbm [shape: f32[16,256], index: 0, kind: input, shape index: {}]   ;;  %s166_s1 = inlined_call_operand.hbm [shape: f32[16,256], index: 1, kind: output, shape index: {}]  }
   0x1   :  { %7 = vsyncpa [#allocation4], 0  ;;  %s121_s6 = smov [#allocation2]   ;;  %s73_s10 = scalar_lea.hbm %s165_s0, 512 }
   0x2   :  { %s13_s7 = sshll.u32 %s121_s6, 4  ;;  %p74_p0 = scmp.ne.s32.totalorder %s165_s0, %s73_s10  ;;  %s14_s7 = int_to_ptr.vmem [resolvable:$true] %s13_s7 }
   0x3   :  { %p77_p1 = scmp.lt.u32.totalorder %s73_s10, %s165_s0 }
   0x5   :  { %p79_p2 = pnand %p77_p1, %p74_p0 }
   0x7   :  { %82 = shalt.err (!%p79_p2)
}
   0x8   :  { %s83_s15 = scalar_lea.vmem %s14_s7, 512  ;;  %p88_p4 = scmp.lt.s32.totalorder %s14_s7, %s14_s7 }
   0x9   :  { %p84_p3 = scmp.ne.s32.totalorder %s14_s7, %s83_s15  ;;  %p89_p5 = scmp.lt.s32.totalorder %s83_s15, %s83_s15 }
   0xb   :  { %p90_p6 = por %p89_p5, %p88_p4 }
   0xd   :  { %p91_p7 = pnand %p90_p6, %p84_p3 }
   0xf   :  { %94 = shalt.err (!%p91_p7)
}
  0x10   :  { %s122_s16 = smov 256   ;;  %s123_s17 = smov 16  }
  0x11   :  { %19 = dma.hbm_to_vmem [thread:$0]  %s165_s0, 512, %s14_s7, [#allocation3], %s122_s16, %s122_s16, %s123_s17  }
  0x12   :  { %117 = dma.done.wait [#allocation3], 512  }
  0x13   :  { %118 = vsyncadd [#allocation3], 4294966784  ;;  %v23_v0 = vld [vmem:[#allocation2] sm:$0xff]  ;;  %v24_v1 = vld [vmem:[#allocation2 + $0x8] sm:$0xff]  ;;  %s124_s20 = smov [#allocation5]  }
  0x14   :  { %v25_v2 = vld [vmem:[#allocation2 + $0x10] sm:$0xff]  ;;  %65 = vlog2.f32 %v23_v0  ;;  %v26_v3 = vld [vmem:[#allocation2 + $0x18] sm:$0xff]  ;;  %s49_s0 = sshll.u32 %s124_s20, 4  ;;  %s50_s0 = int_to_ptr.vmem [resolvable:$true] %s49_s0 }
  0x15   :  { %67 = vlog2.f32 %v24_v1  ;;  %s95_s21 = scalar_lea.vmem %s50_s0, 512  ;;  %p100_p9 = scmp.lt.s32.totalorder %s50_s0, %s50_s0 }
  0x16   :  { %69 = vlog2.f32 %v25_v2  ;;  %p96_p8 = scmp.ne.s32.totalorder %s50_s0, %s95_s21  ;;  %p101_p10 = scmp.lt.s32.totalorder %s95_s21, %s95_s21 }
  0x17   :  { %71 = vlog2.f32 %v26_v3 }
  0x18   :  { %p102_p11 = por %p101_p10, %p100_p9 }
  0x1a   :  { %p103_p12 = pnand %p102_p11, %p96_p8 }
  0x1e   :  { %v66_v4 = vpop.eup %65 }
  0x1f   :  { %v68_v5 = vpop.eup %67  ;;  %v28_v6 = vmul.f32 0.6931472, %v66_v4 }
  0x20   :  { %v70_v7 = vpop.eup %69  ;;  %v30_v8 = vmul.f32 0.6931472, %v68_v5 }
  0x21   :  { %v72_v9 = vpop.eup %71  ;;  %v36_v10 = vmul.f32 1.442695, %v28_v6  ;;  %v32_v11 = vmul.f32 0.6931472, %v70_v7 }
  0x22   :  { %v37_v12 = vmul.f32 1.442695, %v30_v8  ;;  %v34_v13 = vmul.f32 0.6931472, %v72_v9 }
  0x23   :  { %40 = vst [vmem:[#allocation5] sm:$0xff] %v36_v10  ;;  %v38_v14 = vmul.f32 1.442695, %v32_v11 }
  0x24   :  { %41 = vst [vmem:[#allocation5 + $0x8] sm:$0xff] %v37_v12  ;;  %v39_v15 = vmul.f32 1.442695, %v34_v13 }
  0x25   :  { %42 = vst [vmem:[#allocation5 + $0x10] sm:$0xff] %v38_v14 }
  0x26   :  { %43 = vst [vmem:[#allocation5 + $0x18] sm:$0xff] %v39_v15 }
  0x27   :  { %106 = shalt.err (!%p103_p12)
}
  0x28   :  { %s107_s24 = scalar_lea.hbm %s166_s1, 512 }
  0x29   :  { %p108_p13 = scmp.ne.s32.totalorder %s166_s1, %s107_s24  ;;  %p111_p0 = scmp.lt.u32.totalorder %s107_s24, %s166_s1 }
  0x2b   :  { %p113_p1 = pnand %p111_p0, %p108_p13 }
  0x2d   :  { %116 = shalt.err (!%p113_p1)
}
  0x2e   :  { %55 = dma.vmem_to_hbm [thread:$0]  %s50_s0, 512, %s166_s1, [#allocation4], %s122_s16, %s122_s16, %s123_s17  }
  0x2f   :  { %119 = dma.done.wait [#allocation4], 512  }
  0x30   :  { %120 = vsyncadd [#allocation4], 4294966784 }
  0x31   :  { %59 = vsyncpa [#allocation3], 1 }
  0x32   :  { %60 = vsyncpa [#allocation4], 1 }

</bundles_post_ra>
